<compile_context>
chip_gen: v5e
topology: v5e:2x2
jax: 0.10.0
libtpu: 0.0.40
codegen_flags: <defaults>
</compile_context>

<pallas_src>
import math

import jax
import jax.numpy as jnp
from jax import lax
from jax.experimental import pallas as pl
from jax.experimental.pallas import tpu as pltpu

IN_DIM, H1_DIM, H2_DIM, OUT_DIM = 80, 50, 30, 1


def _round_up(n, m):
    return ((n + m - 1) // m) * m


def _cdiv(a, b):
    return -(-a // b)


def value_mlp_kernel(x_ref, w1_ref, b1_ref, w2_ref, b2_ref, w3c_ref, b3_ref, o_ref):
    # Batch-on-lanes formulation: batch stays on the 128-lane axis for all
    # tanh/bias VPU+EUP work and the final lane-dense [1, TILE_B] output row.
    # Layer 1: contract the shared feature axis directly (lhs dim 1 with rhs
    # dim 1) so no standalone transpose of the [TILE_B, 80] tile is emitted.
    h1 = jnp.tanh(
        lax.dot_general(
            w1_ref[...], x_ref[...],
            dimension_numbers=(((1,), (1,)), ((), ())),
            preferred_element_type=jnp.float32,
        )
        + b1_ref[...]
    )                                                                  # [50, TILE_B]
    h2 = jnp.tanh(
        jnp.dot(w2_ref[...], h1, preferred_element_type=jnp.float32) + b2_ref[...]
    )                                                                  # [30, TILE_B]
    # Final layer is a 1x30 dot: do it on VPU (+XLU sublane reduce) and keep
    # the MXU free for layers 1-2.
    h3 = jnp.sum(w3c_ref[...] * h2, axis=0, keepdims=True) + b3_ref[...]  # [1, TILE_B]
    o_ref[...] = h3.astype(o_ref.dtype)


def value_forward(x, params, *, tile_b=8192):
    """x: [B, 80] float32 (output of inputVNNBlock). Returns [B, 1] float32."""
    w1, b1, w2, b2, w3, b3 = params  # W: [out, in] (PyTorch layout), b: [out, 1]
    B = x.shape[0]

    # Batch tile: multiple of 128 (lane-dense output), capped at tile_b, and
    # sized so large batches always get >= 2 grid steps (both v7x TensorCores).
    tb = min(tile_b, _round_up(max(_cdiv(B, 2), 1), 128))
    grid_b = _cdiv(B, tb)
    # Output allocated in whole tiles (write-only, <= tb-1 wasted elements);
    # x itself is NOT padded — the ragged last x block is masked by Pallas.
    b_out = grid_b * tb

    const = lambda i: (0, 0)
    flops = 2 * B * (IN_DIM * H1_DIM + H1_DIM * H2_DIM + H2_DIM * OUT_DIM)
    bytes_accessed = 4 * (
        B * (IN_DIM + OUT_DIM)
        + H1_DIM * (IN_DIM + 1) + H2_DIM * (H1_DIM + 1) + OUT_DIM * (H2_DIM + 1)
    )

    out_row = pl.pallas_call(
        value_mlp_kernel,
        out_shape=jax.ShapeDtypeStruct((1, b_out), jnp.float32),
        grid=(grid_b,),
        in_specs=[
            pl.BlockSpec((tb, IN_DIM), lambda i: (i, 0)),   # x: tiled over batch
            pl.BlockSpec((H1_DIM, IN_DIM), const),          # weights/biases resident
            pl.BlockSpec((H1_DIM, 1), const),
            pl.BlockSpec((H2_DIM, H1_DIM), const),
            pl.BlockSpec((H2_DIM, 1), const),
            pl.BlockSpec((H2_DIM, 1), const),               # w3 as a [30, 1] column
            pl.BlockSpec((OUT_DIM, 1), const),
        ],
        out_specs=pl.BlockSpec((1, tb), lambda i: (0, i)),
        compiler_params=pltpu.CompilerParams(
            dimension_semantics=("parallel",),              # megacore sharding on v7x
        ),
        cost_estimate=pl.CostEstimate(
            flops=flops,
            transcendentals=B * (H1_DIM + H2_DIM),
            bytes_accessed=bytes_accessed,
        ),
    )(x, w1, b1, w2, b2, w3.T, b3)

    # (1, b_out) lane-dense row -> (B, 1) column; leading dim is 1 so element
    # order is preserved by the reshape.
    return out_row[:, :B].reshape(B, 1)


def init_linear(key, fan_in, fan_out):
    # PyTorch nn.Linear default init: U(-1/sqrt(fan_in), 1/sqrt(fan_in)),
    # stored in PyTorch's native [out, in] layout; bias as an [out, 1] column.
    kw, kb = jax.random.split(key)
    bound = 1.0 / math.sqrt(fan_in)
    w = jax.random.uniform(kw, (fan_out, fan_in), jnp.float32, -bound, bound)
    b = jax.random.uniform(kb, (fan_out, 1), jnp.float32, -bound, bound)
    return w, b


def init_value_params(key):
    k1, k2, k3 = jax.random.split(key, 3)
    w1, b1 = init_linear(k1, IN_DIM, H1_DIM)
    w2, b2 = init_linear(k2, H1_DIM, H2_DIM)
    w3, b3 = init_linear(k3, H2_DIM, OUT_DIM)
    return (w1, b1, w2, b2, w3, b3)


def value_reference(x, params):
    w1, b1, w2, b2, w3, b3 = params
    h = jnp.tanh(x @ w1.T + b1.T)
    h = jnp.tanh(h @ w2.T + b2.T)
    return h @ w3.T + b3.T


if __name__ == "__main__":
    key = jax.random.PRNGKey(0)
    k_params, k_x1, k_x2 = jax.random.split(key, 3)
    params = init_value_params(k_params)

    # TODO(synk): inputVNNBlock is an external module passed to forward(); its
    # already-computed [B, 80] output (x.detach()) is used as the kernel input.
    B = 8
    x = jax.random.normal(k_x1, (B, IN_DIM), jnp.float32)
    out = jax.block_until_ready(value_forward(x, params))
    assert out.shape == (B, 1)
    assert jnp.allclose(out, value_reference(x, params), atol=1e-5, rtol=1e-5)

    # Exercise the multi-tile grid + ragged last block (no jnp.pad of x).
    B2 = 300
    x2 = jax.random.normal(k_x2, (B2, IN_DIM), jnp.float32)
    out2 = jax.block_until_ready(value_forward(x2, params, tile_b=128))
    assert out2.shape == (B2, 1)
    assert jnp.allclose(out2, value_reference(x2, params), atol=1e-5, rtol=1e-5)

    # Default tile path on the same ragged batch (tb=256 -> 2 grid steps).
    out3 = jax.block_until_ready(value_forward(x2, params))
    assert out3.shape == (B2, 1)
    assert jnp.allclose(out3, value_reference(x2, params), atol=1e-5, rtol=1e-5)

    print("KERNEL_OK")
</pallas_src>

<mosaic_0001>
module attributes {stable_mosaic.version = 11 : i64} {
  func.func @value_mlp_kernel(%arg0: i32, %arg1: memref<128x80xf32, #tpu.memory_space<vmem>>, %arg2: memref<50x80xf32, #tpu.memory_space<vmem>>, %arg3: memref<50x1xf32, #tpu.memory_space<vmem>>, %arg4: memref<30x50xf32, #tpu.memory_space<vmem>>, %arg5: memref<30x1xf32, #tpu.memory_space<vmem>>, %arg6: memref<30x1xf32, #tpu.memory_space<vmem>>, %arg7: memref<1x1xf32, #tpu.memory_space<vmem>>, %arg8: memref<1x128xf32, #tpu.memory_space<vmem>>) attributes {dimension_semantics = [#tpu.dimension_semantics<parallel>], iteration_bounds = array<i64: 1>, scalar_prefetch = 0 : i64, scratch_operands = 0 : i64, tpu.core_type = #tpu.core_type<tc>, window_params = [{transform_indices = @transform_0, window_bounds = array<i64: 128, 80>}, {pipeline_mode = #tpu.pipeline_mode<synchronous>, transform_indices = @transform_1, window_bounds = array<i64: 50, 80>}, {pipeline_mode = #tpu.pipeline_mode<synchronous>, transform_indices = @transform_2, window_bounds = array<i64: 50, 1>}, {pipeline_mode = #tpu.pipeline_mode<synchronous>, transform_indices = @transform_3, window_bounds = array<i64: 30, 50>}, {pipeline_mode = #tpu.pipeline_mode<synchronous>, transform_indices = @transform_4, window_bounds = array<i64: 30, 1>}, {pipeline_mode = #tpu.pipeline_mode<synchronous>, transform_indices = @transform_5, window_bounds = array<i64: 30, 1>}, {pipeline_mode = #tpu.pipeline_mode<synchronous>, transform_indices = @transform_6, window_bounds = array<i64: 1, 1>}, {transform_indices = @transform_7, window_bounds = array<i64: 1, 128>}]} {
    %c0 = arith.constant 0 : index
    %c0_0 = arith.constant 0 : index
    %0 = vector.load %arg2[%c0, %c0_0] : memref<50x80xf32, #tpu.memory_space<vmem>>, vector<50x80xf32>
    %c0_1 = arith.constant 0 : index
    %c0_2 = arith.constant 0 : index
    %1 = vector.load %arg1[%c0_1, %c0_2] : memref<128x80xf32, #tpu.memory_space<vmem>>, vector<128x80xf32>
    %cst = arith.constant dense<0.000000e+00> : vector<50x128xf32>
    %2 = tpu.matmul %0, %1, %cst {dimension_numbers = #tpu.dot_dimension_numbers<[1], [1], [0], [0], [0, 0, 1, 0], [], []>} : vector<50x80xf32>, vector<128x80xf32>, vector<50x128xf32> -> vector<50x128xf32>
    %c0_3 = arith.constant 0 : index
    %c0_4 = arith.constant 0 : index
    %3 = vector.load %arg3[%c0_3, %c0_4] : memref<50x1xf32, #tpu.memory_space<vmem>>, vector<50x1xf32>
    %4 = vector.broadcast %3 : vector<50x1xf32> to vector<50x128xf32>
    %5 = arith.addf %2, %4 : vector<50x128xf32>
    %6 = math.tanh %5 : vector<50x128xf32>
    %c0_5 = arith.constant 0 : index
    %c0_6 = arith.constant 0 : index
    %7 = vector.load %arg4[%c0_5, %c0_6] : memref<30x50xf32, #tpu.memory_space<vmem>>, vector<30x50xf32>
    %cst_7 = arith.constant dense<0.000000e+00> : vector<30x128xf32>
    %8 = tpu.matmul %7, %6, %cst_7 {dimension_numbers = #tpu.dot_dimension_numbers<[1], [0], [0], [1], [0, 0, 1, 1], [], []>} : vector<30x50xf32>, vector<50x128xf32>, vector<30x128xf32> -> vector<30x128xf32>
    %c0_8 = arith.constant 0 : index
    %c0_9 = arith.constant 0 : index
    %9 = vector.load %arg5[%c0_8, %c0_9] : memref<30x1xf32, #tpu.memory_space<vmem>>, vector<30x1xf32>
    %10 = vector.broadcast %9 : vector<30x1xf32> to vector<30x128xf32>
    %11 = arith.addf %8, %10 : vector<30x128xf32>
    %12 = math.tanh %11 : vector<30x128xf32>
    %c0_10 = arith.constant 0 : index
    %c0_11 = arith.constant 0 : index
    %13 = vector.load %arg6[%c0_10, %c0_11] : memref<30x1xf32, #tpu.memory_space<vmem>>, vector<30x1xf32>
    %14 = vector.broadcast %13 : vector<30x1xf32> to vector<30x128xf32>
    %15 = arith.mulf %14, %12 : vector<30x128xf32>
    %cst_12 = arith.constant dense<0.000000e+00> : vector<128xf32>
    %16 = vector.multi_reduction <add>, %15, %cst_12 [0] : vector<30x128xf32> to vector<128xf32>
    %17 = vector.shape_cast %16 : vector<128xf32> to vector<1x128xf32>
    %c0_13 = arith.constant 0 : index
    %c0_14 = arith.constant 0 : index
    %18 = vector.load %arg7[%c0_13, %c0_14] : memref<1x1xf32, #tpu.memory_space<vmem>>, vector<1x1xf32>
    %19 = vector.broadcast %18 : vector<1x1xf32> to vector<1x128xf32>
    %20 = arith.addf %17, %19 : vector<1x128xf32>
    %c0_15 = arith.constant 0 : index
    %c0_16 = arith.constant 0 : index
    %21 = vector.load %arg8[%c0_15, %c0_16] : memref<1x128xf32, #tpu.memory_space<vmem>>, vector<1x128xf32>
    tpu.vector_store %arg8[%c0_15, %c0_16], %20 {strides = array<i32>} : memref<1x128xf32, #tpu.memory_space<vmem>>, vector<1x128xf32>,
    return
  }
  func.func @transform_0(%arg0: i32) -> (i32, i32) {
    %c0_i32 = arith.constant 0 : i32
    %c0_i32_0 = arith.constant 0 : i32
    return %arg0, %c0_i32 : i32, i32
  }
  func.func @transform_1(%arg0: i32) -> (i32, i32) {
    %c0_i32 = arith.constant 0 : i32
    %c0_i32_0 = arith.constant 0 : i32
    %c0_i32_1 = arith.constant 0 : i32
    return %c0_i32, %c0_i32_0 : i32, i32
  }
  func.func @transform_2(%arg0: i32) -> (i32, i32) {
    %c0_i32 = arith.constant 0 : i32
    %c0_i32_0 = arith.constant 0 : i32
    %c0_i32_1 = arith.constant 0 : i32
    return %c0_i32, %c0_i32_0 : i32, i32
  }
  func.func @transform_3(%arg0: i32) -> (i32, i32) {
    %c0_i32 = arith.constant 0 : i32
    %c0_i32_0 = arith.constant 0 : i32
    %c0_i32_1 = arith.constant 0 : i32
    return %c0_i32, %c0_i32_0 : i32, i32
  }
  func.func @transform_4(%arg0: i32) -> (i32, i32) {
    %c0_i32 = arith.constant 0 : i32
    %c0_i32_0 = arith.constant 0 : i32
    %c0_i32_1 = arith.constant 0 : i32
    return %c0_i32, %c0_i32_0 : i32, i32
  }
  func.func @transform_5(%arg0: i32) -> (i32, i32) {
    %c0_i32 = arith.constant 0 : i32
    %c0_i32_0 = arith.constant 0 : i32
    %c0_i32_1 = arith.constant 0 : i32
    return %c0_i32, %c0_i32_0 : i32, i32
  }
  func.func @transform_6(%arg0: i32) -> (i32, i32) {
    %c0_i32 = arith.constant 0 : i32
    %c0_i32_0 = arith.constant 0 : i32
    %c0_i32_1 = arith.constant 0 : i32
    return %c0_i32, %c0_i32_0 : i32, i32
  }
  func.func @transform_7(%arg0: i32) -> (i32, i32) {
    %c0_i32 = arith.constant 0 : i32
    %c0_i32_0 = arith.constant 0 : i32
    return %c0_i32, %arg0 : i32, i32
  }
}

</mosaic_0001>

<bundles_post_ra>
// kernel: tpu_custom_call.1
= control target key start
LH: loop header
LB: loop body
LE: loop exit
PB: predicated region body
PF: predicated region fallthrough
CT: control target
= control target key end

     0   :  { %s693_s0 = inlined_call_operand.vmem [shape: f32[8,80], index: 0, kind: input, shape index: {}]   ;;  %s694_s1 = inlined_call_operand.vmem [shape: f32[50,80], index: 1, kind: input, shape index: {}]   ;;  %s695_s2 = inlined_call_operand.vmem [shape: f32[50,1], index: 2, kind: input, shape index: {}]   ;;  %s696_s3 = inlined_call_operand.vmem [shape: f32[30,50], index: 3, kind: input, shape index: {}]   ;;  %s697_s4 = inlined_call_operand.vmem [shape: f32[30,1], index: 4, kind: input, shape index: {}]   ;;  %s698_s5 = inlined_call_operand.vmem [shape: f32[30,1], index: 5, kind: input, shape index: {}]   ;;  %s699_s6 = inlined_call_operand.<no memory space> [shape: f32[1,1], index: 6, kind: input, shape index: {}]   ;;  %s700_s7 = inlined_call_operand.hbm [shape: f32[1,128], index: 7, kind: output, shape index: {}]  }
   0x1   :  { %v12_v0 = vstv %s699_s6 }
   0x2   :  { %13 = vst [vmem:[#allocation2] sm:$0x1] %v12_v0 }
   0x3   :  { %v51_v1 = vld [vmem:[%s693_s0 + $0x78] sm:$0xff]  ;;  %vm94_vm0 = vcmask 654336   ;;  %v50_v2 = vld [vmem:[%s693_s0 + $0x70] sm:$0xff] }
   0x4   :  { %380 = vmatpush.xpose.msk.msra.mxu3 %vm94_vm0, %v51_v1  ;;  %379 = vmatpush.xpose.msk.msra.mxu2 %vm94_vm0, %v51_v1 }
   0x5   :  { %351 = vmatpush.xpose.msk.msra.mxu0 %vm94_vm0, %v51_v1 }
   0x6   :  { %14 = vsyncpa [#allocation4], 0  ;;  %v49_v3 = vld [vmem:[%s693_s0 + $0x68] sm:$0xff]  ;;  %v48_v4 = vld [vmem:[%s693_s0 + $0x60] sm:$0xff]  ;;  %v464_v10 = vmov 0   ;;  %vm250_vm1 = vcmask 1041408  }
   0x7   :  { %v47_v5 = vld [vmem:[%s693_s0 + $0x58] sm:$0xff]  ;;  %v46_v6 = vld [vmem:[%s693_s0 + $0x50] sm:$0xff]  ;;  %v45_v7 = vld [vmem:[%s693_s0 + $0x48] sm:$0xff]  ;;  %413 = vset.pattern.permute.xlu0 %v464_v10  ;;  %414 = vset.pattern.permute.xlu1 %v464_v10  ;;  %vm237_vm2 = vcmask 408576   ;;  %vm317_vm3 = vcmask 1045504   ;;  %s342_s11 = sshll.u32 %s700_s7, 4  ;;  %s343_s11 = int_to_ptr.hbm [resolvable:$true] %s342_s11 }
   0x8   :  { %382 = vmatpush.xpose.msk.msra.mxu3 %vm94_vm0, %v50_v2  ;;  %381 = vmatpush.xpose.msk.msra.mxu2 %vm94_vm0, %v50_v2  ;;  %v58_v8 = vld [vmem:[%s695_s2 + $0x30] sm:$0x3]  ;;  %v44_v9 = vld [vmem:[%s693_s0 + $0x40] sm:$0xff]  ;;  %v43_v11 = vld [vmem:[%s693_s0 + $0x38] sm:$0xff] }
   0x9   :  { %352 = vmatpush.xpose.msk.msra.mxu0 %vm94_vm0, %v50_v2  ;;  %91 = vperm.xlu0 %413, %v58_v8   ;;  %v57_v12 = vld [vmem:[%s695_s2 + $0x28] sm:$0xff]  ;;  %v56_v13 = vld [vmem:[%s695_s2 + $0x20] sm:$0xff]  ;;  %v42_v14 = vld [vmem:[%s693_s0 + $0x30] sm:$0xff] }
   0xa   :  { %415 = vset.pattern.permute.xlu2 %v464_v10  ;;  %81 = vperm.xlu1 %414, %v56_v13   ;;  %v41_v15 = vld [vmem:[%s693_s0 + $0x28] sm:$0xff]  ;;  %v52_v16 = vld [vmem:[%s695_s2] sm:$0xff]  ;;  %v55_v17 = vld [vmem:[%s695_s2 + $0x18] sm:$0xff] }
   0xb   :  { %v40_v18 = vld [vmem:[%s693_s0 + $0x20] sm:$0xff]  ;;  %v39_v19 = vld [vmem:[%s693_s0 + $0x18] sm:$0xff]  ;;  %v215_v20 = vld [vmem:[%s697_s4 + $0x10] sm:$0xff] }
   0xc   :  { %384 = vmatpush.xpose.msk.msra.mxu3 %vm94_vm0, %v49_v3  ;;  %383 = vmatpush.xpose.msk.msra.mxu2 %vm94_vm0, %v49_v3  ;;  %v213_v21 = vld [vmem:[%s697_s4] sm:$0xff]  ;;  %v38_v22 = vld [vmem:[%s693_s0 + $0x10] sm:$0xff]  ;;  %v37_v23 = vld [vmem:[%s693_s0 + $0x8] sm:$0xff] }
   0xd   :  { %353 = vmatpush.xpose.msk.msra.mxu0 %vm94_vm0, %v49_v3  ;;  %v288_v24 = vld [vmem:[%s698_s5 + $0x8] sm:$0xff]  ;;  %v216_v25 = vld [vmem:[%s697_s4 + $0x18] sm:$0x3f]  ;;  %v54_v26 = vld [vmem:[%s695_s2 + $0x10] sm:$0xff] }
   0xe   :  { %v36_v27 = vld [vmem:[%s693_s0] sm:$0xff]  ;;  %71 = vperm.xlu2 %415, %v54_v26   ;;  %v32_v28 = vld [vmem:[%s694_s1 + $0x18] sm:$0xff]  ;;  %v30_v29 = vld [vmem:[%s694_s1 + $0x8] sm:$0xff] }
   0xf   :  { %v29_v30 = vld [vmem:[%s694_s1] sm:$0xff]  ;;  %v289_v31 = vld [vmem:[%s698_s5 + $0x10] sm:$0xff]  ;;  %v53_v33 = vld [vmem:[%s695_s2 + $0x8] sm:$0xff] }
  0x10   :  { %386 = vmatpush.xpose.msk.msra.mxu3 %vm94_vm0, %v48_v4  ;;  %385 = vmatpush.xpose.msk.msra.mxu2 %vm94_vm0, %v48_v4  ;;  %v326_v32 = vld [vmem:[#allocation2] sm:$0x1]  ;;  %v31_v35 = vld [vmem:[%s694_s1 + $0x10] sm:$0xff]  ;;  %v214_v36 = vld [vmem:[%s697_s4 + $0x8] sm:$0xff] }
  0x11   :  { %354 = vmatpush.xpose.msk.msra.mxu0 %vm94_vm0, %v48_v4  ;;  %86 = vperm.xlu0 %413, %v57_v12   ;;  %v33_v34 = vld [vmem:[%s694_s1 + $0x20] sm:$0xff]  ;;  %v34_v37 = vld [vmem:[%s694_s1 + $0x28] sm:$0xff]  ;;  %v35_v39 = vld [vmem:[%s694_s1 + $0x30] sm:$0x3] }
  0x12   :  { %76 = vperm.xlu1 %414, %v55_v17   ;;  %v287_v38 = vld [vmem:[%s698_s5] sm:$0xff]  ;;  %v290_v40 = vld [vmem:[%s698_s5 + $0x18] sm:$0x3f] }
  0x13   :  { %v209_v4 = vld [vmem:[%s696_s3] sm:$0xff]  ;;  %v212_v8 = vld [vmem:[%s696_s3 + $0x18] sm:$0x3f] }
  0x14   :  { %388 = vmatpush.xpose.msk.msra.mxu3 %vm94_vm0, %v47_v5  ;;  %387 = vmatpush.xpose.msk.msra.mxu2 %vm94_vm0, %v47_v5 }
  0x15   :  { %355 = vmatpush.xpose.msk.msra.mxu0 %vm94_vm0, %v47_v5 }
  0x16   :  { %66 = vperm.xlu2 %415, %v53_v33  }
  0x18   :  { %390 = vmatpush.xpose.msk.msra.mxu3 %vm94_vm0, %v46_v6  ;;  %389 = vmatpush.xpose.msk.msra.mxu2 %vm94_vm0, %v46_v6 }
  0x19   :  { %356 = vmatpush.xpose.msk.msra.mxu0 %vm94_vm0, %v46_v6  ;;  %61 = vperm.xlu0 %413, %v52_v16   ;;  %v210_v6 = vld [vmem:[%s696_s3 + $0x8] sm:$0xff] }
  0x1a   :  { %219 = vperm.xlu1 %414, %v213_v21  }
  0x1c   :  { %392 = vmatpush.xpose.msk.msra.mxu3 %vm94_vm0, %v45_v7  ;;  %391 = vmatpush.xpose.msk.msra.mxu2 %vm94_vm0, %v45_v7 }
  0x1d   :  { %357 = vmatpush.xpose.msk.msra.mxu0 %vm94_vm0, %v45_v7  ;;  %v211_v7 = vld [vmem:[%s696_s3 + $0x10] sm:$0xff]  ;;  %s465_s3 = smov [#allocation3]  }
  0x1e   :  { %224 = vperm.xlu2 %415, %v214_v36   ;;  %s340_s9 = sshll.u32 %s465_s3, 4  ;;  %s341_s9 = int_to_ptr.vmem [resolvable:$true] %s340_s9 }
  0x20   :  { %394 = vmatpush.xpose.msk.msra.mxu3 %vm94_vm0, %v44_v9  ;;  %393 = vmatpush.xpose.msk.msra.mxu2 %vm94_vm0, %v44_v9 }
  0x21   :  { %358 = vmatpush.xpose.msk.msra.mxu0 %vm94_vm0, %v44_v9  ;;  %229 = vperm.xlu0 %413, %v215_v20  }
  0x22   :  { %234 = vperm.xlu1 %414, %v216_v25  }
  0x24   :  { %396 = vmatpush.xpose.msk.msra.mxu3 %vm94_vm0, %v43_v11  ;;  %395 = vmatpush.xpose.msk.msra.mxu2 %vm94_vm0, %v43_v11 }
  0x25   :  { %359 = vmatpush.xpose.msk.msra.mxu0 %vm94_vm0, %v43_v11 }
  0x26   :  { %293 = vperm.xlu2 %415, %v287_v38  }
  0x28   :  { %398 = vmatpush.xpose.msk.msra.mxu3 %vm94_vm0, %v42_v14  ;;  %397 = vmatpush.xpose.msk.msra.mxu2 %vm94_vm0, %v42_v14 }
  0x29   :  { %360 = vmatpush.xpose.msk.msra.mxu0 %vm94_vm0, %v42_v14  ;;  %298 = vperm.xlu0 %413, %v288_v24  }
  0x2a   :  { %303 = vperm.xlu1 %414, %v289_v31  }
  0x2c   :  { %400 = vmatpush.xpose.msk.msra.mxu3 %vm94_vm0, %v41_v15  ;;  %399 = vmatpush.xpose.msk.msra.mxu2 %vm94_vm0, %v41_v15 }
  0x2d   :  { %361 = vmatpush.xpose.msk.msra.mxu0 %vm94_vm0, %v41_v15 }
  0x2e   :  { %308 = vperm.xlu2 %415, %v290_v40  }
  0x30   :  { %402 = vmatpush.xpose.msk.msra.mxu3 %vm94_vm0, %v40_v18  ;;  %401 = vmatpush.xpose.msk.msra.mxu2 %vm94_vm0, %v40_v18 }
  0x31   :  { %362 = vmatpush.xpose.msk.msra.mxu0 %vm94_vm0, %v40_v18  ;;  %329 = vperm.xlu0 %413, %v326_v32  }
  0x34   :  { %404 = vmatpush.xpose.msk.msra.mxu3 %vm94_vm0, %v39_v19  ;;  %403 = vmatpush.xpose.msk.msra.mxu2 %vm94_vm0, %v39_v19 }
  0x35   :  { %363 = vmatpush.xpose.msk.msra.mxu0 %vm94_vm0, %v39_v19 }
  0x38   :  { %406 = vmatpush.xpose.msk.msra.mxu3 %vm94_vm0, %v38_v22  ;;  %405 = vmatpush.xpose.msk.msra.mxu2 %vm94_vm0, %v38_v22 }
  0x39   :  { %364 = vmatpush.xpose.msk.msra.mxu0 %vm94_vm0, %v38_v22 }
  0x3c   :  { %408 = vmatpush.xpose.msk.msra.mxu3 %vm94_vm0, %v37_v23  ;;  %407 = vmatpush.xpose.msk.msra.mxu2 %vm94_vm0, %v37_v23 }
  0x3d   :  { %365 = vmatpush.xpose.msk.msra.mxu0 %vm94_vm0, %v37_v23 }
  0x40   :  { %410 = vmatpush.xpose.msk.msra.mxu3 %vm94_vm0, %v36_v27  ;;  %409 = vmatpush.xpose.msk.msra.mxu2 %vm94_vm0, %v36_v27 }
  0x41   :  { %366 = vmatpush.xpose.msk.msra.mxu0 %vm94_vm0, %v36_v27 }
  0x43   :  { %370 = vmatmul.msk.f32.vlgmr.msra.gmra.mxu3 %vm94_vm0, %v32_v28  ;;  %368 = vmatmul.msk.f32.vlgmr.msra.gmra.mxu2 %vm94_vm0, %v30_v29 }
  0x44   :  { %367 = vmatmul.msk.f32.vlgmr.msra.gmra.mxu0 %vm94_vm0, %v29_v30 }
  0x4b   :  { %371 = vmatmul.msk.f32.gmra.mxu3 %vm94_vm0, %v33_v34  ;;  %369 = vmatmul.msk.f32.gmra.mxu2 %vm94_vm0, %v31_v35 }
  0x53   :  { %372 = vmatmul.msk.f32.gmra.mxu3 %vm94_vm0, %v34_v37 }
  0x5b   :  { %373 = vmatmul.msk.f32.gmra.mxu3 %vm94_vm0, %v35_v39 }
  0x68   :  { %v72_v47 = vpop.permute.xlu2 %71 }
  0x70   :  { %v67_v57 = vpop.permute.xlu2 %66 }
  0x78   :  { %v225_v12 = vpop.permute.xlu2 %224 }
  0x7b   :  { %v92_v43 = vpop.permute.xlu0 %91 }
  0x7c   :  { %v82_v45 = vpop.permute.xlu1 %81 }
  0x80   :  { %v294_v19 = vpop.permute.xlu2 %293 }
  0x83   :  { %v87_v48 = vpop.permute.xlu0 %86 }
  0x84   :  { %v77_v53 = vpop.permute.xlu1 %76 }
  0x88   :  { %v309_v31 = vpop.permute.xlu2 %308 }
  0x8b   :  { %v62_v61 = vpop.permute.xlu0 %61 }
  0x8c   :  { %v220_v11 = vpop.permute.xlu1 %219 }
  0x93   :  { %v230_v15 = vpop.permute.xlu0 %229 }
  0x94   :  { %v235_v18 = vpop.permute.xlu1 %234 }
  0x9b   :  { %v299_v25 = vpop.permute.xlu0 %298 }
  0x9c   :  { %v304_v27 = vpop.permute.xlu1 %303 }
  0xc1   :  { %v181_v58 = vpop.f32.mrf.mxu0 }
  0xc2   :  { %v182_v63 = vadd.f32 %v181_v58, %v62_v61 }
  0xc6   :  { %v190_v41 = vpop.f32.mrf.mxu3  ;;  %v184_v46 = vpop.f32.mrf.mxu2 }
  0xc7   :  { %v191_v55 = vadd.f32 %v190_v41, %v77_v53  ;;  %v185_v60 = vadd.f32 %v184_v46, %v67_v57  ;;  %v330_v41 = vpop.permute.xlu0 %329 }
  0xce   :  { %v193_v42 = vpop.f32.mrf.mxu3  ;;  %v187_v54 = vpop.f32.mrf.mxu2 }
  0xcf   :  { %v194_v52 = vadd.f32 %v193_v42, %v82_v45  ;;  %v188_v56 = vadd.f32 %v187_v54, %v72_v47 }
  0xd6   :  { %v196_v44 = vpop.f32.mrf.mxu3 }
  0xd7   :  { %v197_v50 = vadd.f32 %v196_v44, %v87_v48 }
  0xde   :  { %v199_v49 = vpop.f32.mrf.mxu3 }
  0xdf   :  { %v200_v51 = vadd.f32 %v199_v49, %v92_v43  ;;  %v332_v43 = vperm.slane %v330_v41, 0 }
  0xe1   :  { %416 = vtanh.f32 %v200_v51 }
  0xe2   :  { %418 = vtanh.f32 %v197_v50 }
  0xe3   :  { %420 = vtanh.f32 %v194_v52 }
  0xe4   :  { %422 = vtanh.f32 %v191_v55 }
  0xe5   :  { %424 = vtanh.f32 %v188_v56 }
  0xe6   :  { %426 = vtanh.f32 %v185_v60 }
  0xe7   :  { %v417_v59 = vpop.eup %416  ;;  %428 = vtanh.f32 %v182_v63 }
  0xe8   :  { %374 = vmatpush.msk.msra.mxu1 %vm250_vm1, %v417_v59  ;;  %v419_v62 = vpop.eup %418 }
  0xe9   :  { %v421_v0 = vpop.eup %420 }
  0xea   :  { %264 = vmatpush.msra.mxu1 %v419_v62  ;;  %v423_v1 = vpop.eup %422 }
  0xeb   :  { %v425_v2 = vpop.eup %424 }
  0xec   :  { %265 = vmatpush.msra.mxu1 %v421_v0  ;;  %v427_v3 = vpop.eup %426 }
  0xed   :  { %v429_v5 = vpop.eup %428 }
  0xee   :  { %266 = vmatpush.msra.mxu1 %v423_v1 }
  0xf0   :  { %267 = vmatpush.msra.mxu1 %v425_v2 }
  0xf2   :  { %268 = vmatpush.msra.mxu1 %v427_v3 }
  0xf4   :  { %269 = vmatpush.msra.mxu1 %v429_v5 }
  0xf5   :  { %375 = vmatmul.msk.f32.vlgmr.msra.gmra.mxu1 %vm237_vm2, %v209_v4 }
  0xfd   :  { %376 = vmatmul.msk.f32.gmra.mxu1 %vm237_vm2, %v210_v6 }
 0x105   :  { %377 = vmatmul.msk.f32.gmra.mxu1 %vm237_vm2, %v211_v7 }
 0x10d   :  { %378 = vmatmul.msk.f32.gmra.mxu1 %vm237_vm2, %v212_v8 }
 0x172   :  { %v271_v9 = vpop.f32.mrf.mxu1 }
 0x173   :  { %v272_v16 = vadd.f32 %v271_v9, %v220_v11 }
 0x17a   :  { %v274_v10 = vpop.f32.mrf.mxu1 }
 0x17b   :  { %v275_v13 = vadd.f32 %v274_v10, %v225_v12 }
 0x17d   :  { %430 = vtanh.f32 %v275_v13 }
 0x17e   :  { %432 = vtanh.f32 %v272_v16 }
 0x182   :  { %v277_v14 = vpop.f32.mrf.mxu1 }
 0x183   :  { %v278_v17 = vadd.f32 %v277_v14, %v230_v15  ;;  %v431_v22 = vpop.eup %430 }
 0x184   :  { %v433_v23 = vpop.eup %432  ;;  %v312_v26 = vmul.f32 %v431_v22, %v299_v25 }
 0x185   :  { %434 = vtanh.f32 %v278_v17  ;;  %v311_v28 = vmul.f32 %v433_v23, %v294_v19 }
 0x187   :  { %v315_v32 = vadd.f32 %v312_v26, %v311_v28 }
 0x18a   :  { %v280_v20 = vpop.f32.mrf.mxu1 }
 0x18b   :  { %v281_v21 = vadd.f32 %v280_v20, %v235_v18  ;;  %v435_v24 = vpop.eup %434 }
 0x18c   :  { %v313_v29 = vmul.f32 %v435_v24, %v304_v27 }
 0x18d   :  { %436 = vtanh.f32 %v281_v21 }
 0x18e   :  { %v316_v34 = vadd.f32 %v315_v32, %v313_v29 }
 0x193   :  { %v437_v30 = vpop.eup %436 }
 0x194   :  { %v314_v33 = vmul.f32 %v437_v30, %v309_v31 }
 0x196   :  { %v318_v35 = vsel %vm317_vm3, %v314_v33, 0.0 }
 0x197   :  { %v319_v36 = vadd.f32 %v318_v35, %v316_v34 }
 0x199   :  { %v320_v37 = vrot.slane %v319_v36, 4 }
 0x19b   :  { %v321_v38 = vadd.f32 %v320_v37, %v319_v36 }
 0x19d   :  { %v322_v39 = vrot.slane %v321_v38, 2 }
 0x19f   :  { %v323_v40 = vadd.f32 %v322_v39, %v321_v38 }
 0x1a1   :  { %v324_v42 = vrot.slane %v323_v40, 1 }
 0x1a3   :  { %v325_v44 = vadd.f32 %v324_v42, %v323_v40 }
 0x1a5   :  { %v333_v45 = vadd.f32 %v332_v43, %v325_v44 }
 0x1a7   :  { %334 = vst [vmem:[#allocation3] sm:$0x1] %v333_v45 }
 0x1a8   :  { %345 = dma.vmem_to_hbm [thread:$0]  %s341_s9, 16, %s343_s11, [#allocation4]  }
 0x1a9   :  { %462 = dma.done.wait [#allocation4], 16  }
 0x1aa   :  { %463 = vsyncadd [#allocation4], 4294967280 }
 0x1ab   :  { %350 = vsyncpa [#allocation4], 1 }

</bundles_post_ra>
